<compile_context>
chip_gen: v6e
topology: v6e:2x2x1
jax: 0.10.0
libtpu: 0.0.40
codegen_flags: <defaults>
</compile_context>

<pallas_src>
import functools

import jax
import jax.numpy as jnp
from jax.experimental import pallas as pl
from jax.experimental.pallas import tpu as pltpu


# --------------------------------------------------------------------------
# Model hyper-parameters (PyTorch __init__ defaults)
# --------------------------------------------------------------------------
INPUT_DIM = 4
OUTPUT_DIM = 1
OUTPUT_CHUNK_LENGTH = 10
WINDOW = 5
HIDDEN_DIM = 32
N_LAYERS = 3  # -> n_layers - 2 = 1 hidden Linear(hidden, hidden)

IN_FEATURES = INPUT_DIM * WINDOW                       # 20
OUT_FEATURES = OUTPUT_DIM * OUTPUT_CHUNK_LENGTH * 3    # 30


def _round_up(n, m):
    return ((n + m - 1) // m) * m


@functools.lru_cache(maxsize=None)
def _tile_budget():
    """(max batch tile, vmem_limit_bytes), gated on the chip's physical VMEM.

    Per-tile VMEM is dominated by the 4 lane-padded input buffers
    (4 streams x 2 bufs x tb x 512 B) plus the output double-buffer and the
    [tb, hidden] intermediates:  ~6.5 KiB per batch row.
      tb=8192 -> ~52 MiB  (fits v5e/v6e 128 MiB physical VMEM)
      tb=4096 -> ~26 MiB  (fits v7x 64 MiB physical VMEM)
    """
    try:
        vmem_bytes = int(pltpu.get_tpu_info().vmem_capacity_bytes)
    except Exception:  # noqa: BLE001  - be conservative if the query fails
        vmem_bytes = 64 * 1024 * 1024
    if vmem_bytes >= 100 * 1024 * 1024:      # v5e / v6e: 128 MiB VMEM
        return 8192, 96 * 1024 * 1024
    return 4096, 48 * 1024 * 1024            # v7x: 64 MiB VMEM per TensorCore


# --------------------------------------------------------------------------
# Pallas kernel: fused 3-layer MLP (Linear+ReLU, Linear+ReLU, Linear)
# --------------------------------------------------------------------------
def mlp_kernel(x1p_ref, x2p_ref, up_ref, x1f_ref,
               w1c_ref, b1_ref, w2_ref, b2_ref, w3_ref, b3_ref,
               o_ref, *, window):
    f32 = jnp.float32
    nt = (((1,), (1,)), ((), ()))   # A @ B^T : contract last dim of both

    # --- input layer with the cat(dim=-1)+flatten fused away -----------------
    # PyTorch feature order is interleaved: f = 4*t + k (k = stream index), so
    # W1[:, k::4] is the [hidden, window] chunk for stream k and summing the
    # four small A @ B^T dots reproduces Linear(flatten(cat(...))) exactly.
    h = jax.lax.dot_general(x1p_ref[...], w1c_ref[0], nt,
                            preferred_element_type=f32)
    h = h + jax.lax.dot_general(x2p_ref[...], w1c_ref[1], nt,
                                preferred_element_type=f32)
    h = h + jax.lax.dot_general(up_ref[...], w1c_ref[2], nt,
                                preferred_element_type=f32)
    # x1_future arrives full length; the min_len cut is a static lane slice.
    h = h + jax.lax.dot_general(x1f_ref[:, :window], w1c_ref[3], nt,
                                preferred_element_type=f32)
    h = jnp.maximum(h + b1_ref[...], 0.0)                        # [tb, hidden]
    # Dropout: identity at inference.

    # --- hidden layer (n_layers - 2 == 1), raw PyTorch [out, in] weight -------
    h = jax.lax.dot_general(h, w2_ref[...], nt, preferred_element_type=f32)
    h = jnp.maximum(h + b2_ref[...], 0.0)                        # [tb, hidden]

    # --- output layer, stored batch-major (no wrapper transpose needed) -------
    out = jax.lax.dot_general(h, w3_ref[...], nt, preferred_element_type=f32)
    o_ref[...] = out + b3_ref[...]                               # [tb, 30]


# --------------------------------------------------------------------------
# Wrapper
# --------------------------------------------------------------------------
@jax.jit
def dpc_policy_forward(x1_past, x2_past, u_past, x1_future, params):
    """Reproduces DPC_Policy_x1.forward (inference).

    x1_past, x2_past, u_past: [B, w, 1]; x1_future: [B, p, 1] with p >= w.
    Returns: [B, output_chunk_length, output_dim, 3].
    """
    B, window = x1_past.shape[0], x1_past.shape[1]
    p_len = x1_future.shape[1]

    # Free views: drop the trailing singleton dim (no concat, no HBM round trip).
    x1p = x1_past.reshape(B, window).astype(jnp.float32)
    x2p = x2_past.reshape(B, window).astype(jnp.float32)
    up = u_past.reshape(B, window).astype(jnp.float32)
    x1f = x1_future.reshape(B, p_len).astype(jnp.float32)

    w1c, b1 = params["w1c"], params["b1"]   # [4, hidden, window], [1, hidden]
    w2, b2 = params["w2"], params["b2"]     # [hidden, hidden],    [1, hidden]
    w3, b3 = params["w3"], params["b3"]     # [out, hidden],       [1, out]
    hidden = w2.shape[0]
    out_f = w3.shape[0]

    # Batch tile: multiple of 128, >= 4 grid steps once B is large enough
    # (pipeline overlap + work for both v7x TensorCores), capped per-chip.
    tb_cap, vmem_limit = _tile_budget()
    tb = min(tb_cap, _round_up(pl.cdiv(B, 4), 128))
    grid = (pl.cdiv(B, tb),)   # remainder block: Pallas pads reads / clips writes

    def batch_spec(cols):
        return pl.BlockSpec((tb, cols), lambda i: (i, 0))

    def const_spec(shape):  # resident in VMEM across the whole grid
        return pl.BlockSpec(shape, lambda i, _n=len(shape): (0,) * _n)

    flops = 2 * B * (INPUT_DIM * window * hidden + hidden * hidden + hidden * out_f)
    bytes_accessed = 4 * B * (3 * window + p_len + out_f) + 4 * (
        w1c.size + b1.size + w2.size + b2.size + w3.size + b3.size)

    out = pl.pallas_call(
        functools.partial(mlp_kernel, window=window),
        out_shape=jax.ShapeDtypeStruct((B, out_f), jnp.float32),
        grid=grid,
        in_specs=[
            batch_spec(window),            # x1_past
            batch_spec(window),            # x2_past
            batch_spec(window),            # u_past
            batch_spec(p_len),             # x1_future (sliced to window in-kernel)
            const_spec(w1c.shape),
            const_spec(b1.shape),
            const_spec(w2.shape),
            const_spec(b2.shape),
            const_spec(w3.shape),
            const_spec(b3.shape),
        ],
        out_specs=pl.BlockSpec((tb, out_f), lambda i: (i, 0)),
        compiler_params=pltpu.CompilerParams(
            dimension_semantics=("parallel",),   # shard batch over v7x's 2 TCs
            vmem_limit_bytes=vmem_limit),
        cost_estimate=pl.CostEstimate(
            flops=flops, transcendentals=0, bytes_accessed=bytes_accessed),
    )(x1p, x2p, up, x1f, w1c, b1, w2, b2, w3, b3)

    # Batch-major already: this reshape is a free view (no transpose, no HBM pass).
    return out.reshape(B, OUTPUT_CHUNK_LENGTH, OUTPUT_DIM, 3)


# --------------------------------------------------------------------------
# Synthetic parameters in PyTorch nn.Linear layout ([out, in] weights)
# --------------------------------------------------------------------------
def init_torch_params(key):
    def linear(k, fan_in, fan_out):
        kw, kb = jax.random.split(k)
        bound = 1.0 / jnp.sqrt(jnp.float32(fan_in))
        w = jax.random.uniform(kw, (fan_out, fan_in), jnp.float32, -bound, bound)
        b = jax.random.uniform(kb, (fan_out,), jnp.float32, -bound, bound)
        return w, b

    k1, k2, k3 = jax.random.split(key, 3)
    return {
        "input": linear(k1, IN_FEATURES, HIDDEN_DIM),
        "hidden0": linear(k2, HIDDEN_DIM, HIDDEN_DIM),
        "output": linear(k3, HIDDEN_DIM, OUT_FEATURES),
    }


def prepare_params(tp):
    """One-time prep: per-stream W1 chunks; everything else stays PyTorch layout."""
    w1, b1 = tp["input"]      # [H, 20], [H]
    w2, b2 = tp["hidden0"]    # [H, H],  [H]
    w3, b3 = tp["output"]     # [30, H], [30]
    # Per-stream column chunks of the interleaved W1 (feature index f = 4*t + k).
    w1c = jnp.stack([w1[:, k::INPUT_DIM] for k in range(INPUT_DIM)], axis=0)
    return {
        "w1c": w1c,                 # [4, hidden, window]
        "b1": b1.reshape(1, -1),    # [1, hidden]
        "w2": w2,                   # [hidden, hidden]
        "b2": b2.reshape(1, -1),    # [1, hidden]
        "w3": w3,                   # [out, hidden]
        "b3": b3.reshape(1, -1),    # [1, out]
    }


# --------------------------------------------------------------------------
# Pure-JAX reference (uses raw PyTorch-layout params + explicit concat)
# --------------------------------------------------------------------------
def reference_forward(x1_past, x2_past, u_past, x1_future, tp):
    w1, b1 = tp["input"]
    w2, b2 = tp["hidden0"]
    w3, b3 = tp["output"]
    B, w = x1_past.shape[0], x1_past.shape[1]
    x = jnp.concatenate(
        [x1_past, x2_past, u_past, x1_future[:, :w]], axis=-1
    ).reshape(B, -1).astype(jnp.float32)
    h = jnp.maximum(x @ w1.T + b1, 0.0)
    h = jnp.maximum(h @ w2.T + b2, 0.0)
    out = h @ w3.T + b3
    return out.reshape(B, OUTPUT_CHUNK_LENGTH, OUTPUT_DIM, 3)


if __name__ == "__main__":
    key = jax.random.PRNGKey(0)
    kp, k1, k2, k3, k4 = jax.random.split(key, 5)

    B = 8
    x1_past = jax.random.normal(k1, (B, WINDOW, 1), jnp.float32)
    x2_past = jax.random.normal(k2, (B, WINDOW, 1), jnp.float32)
    u_past = jax.random.normal(k3, (B, WINDOW, 1), jnp.float32)
    x1_future = jax.random.normal(k4, (B, OUTPUT_CHUNK_LENGTH, 1), jnp.float32)

    torch_params = init_torch_params(kp)
    params = prepare_params(torch_params)

    out = dpc_policy_forward(x1_past, x2_past, u_past, x1_future, params)
    out = jax.block_until_ready(out)

    ref = reference_forward(x1_past, x2_past, u_past, x1_future, torch_params)
    assert out.shape == (B, OUTPUT_CHUNK_LENGTH, OUTPUT_DIM, 3), out.shape
    assert jnp.allclose(out, ref, atol=1e-4, rtol=1e-4), "mismatch vs reference"

    print("KERNEL_OK")
</pallas_src>

<mosaic_0001>
module attributes {stable_mosaic.version = 11 : i64} {
  func.func @mlp_kernel(%arg0: i32, %arg1: memref<128x5xf32, #tpu.memory_space<vmem>>, %arg2: memref<128x5xf32, #tpu.memory_space<vmem>>, %arg3: memref<128x5xf32, #tpu.memory_space<vmem>>, %arg4: memref<128x10xf32, #tpu.memory_space<vmem>>, %arg5: memref<4x32x5xf32, #tpu.memory_space<vmem>>, %arg6: memref<1x32xf32, #tpu.memory_space<vmem>>, %arg7: memref<32x32xf32, #tpu.memory_space<vmem>>, %arg8: memref<1x32xf32, #tpu.memory_space<vmem>>, %arg9: memref<30x32xf32, #tpu.memory_space<vmem>>, %arg10: memref<1x30xf32, #tpu.memory_space<vmem>>, %arg11: memref<128x30xf32, #tpu.memory_space<vmem>>) attributes {dimension_semantics = [#tpu.dimension_semantics<parallel>], iteration_bounds = array<i64: 1>, scalar_prefetch = 0 : i64, scratch_operands = 0 : i64, tpu.core_type = #tpu.core_type<tc>, window_params = [{transform_indices = @transform_0, window_bounds = array<i64: 128, 5>}, {transform_indices = @transform_1, window_bounds = array<i64: 128, 5>}, {transform_indices = @transform_2, window_bounds = array<i64: 128, 5>}, {transform_indices = @transform_3, window_bounds = array<i64: 128, 10>}, {pipeline_mode = #tpu.pipeline_mode<synchronous>, transform_indices = @transform_4, window_bounds = array<i64: 4, 32, 5>}, {pipeline_mode = #tpu.pipeline_mode<synchronous>, transform_indices = @transform_5, window_bounds = array<i64: 1, 32>}, {pipeline_mode = #tpu.pipeline_mode<synchronous>, transform_indices = @transform_6, window_bounds = array<i64: 32, 32>}, {pipeline_mode = #tpu.pipeline_mode<synchronous>, transform_indices = @transform_7, window_bounds = array<i64: 1, 32>}, {pipeline_mode = #tpu.pipeline_mode<synchronous>, transform_indices = @transform_8, window_bounds = array<i64: 30, 32>}, {pipeline_mode = #tpu.pipeline_mode<synchronous>, transform_indices = @transform_9, window_bounds = array<i64: 1, 30>}, {transform_indices = @transform_10, window_bounds = array<i64: 128, 30>}]} {
    %c0 = arith.constant 0 : index
    %c0_0 = arith.constant 0 : index
    %0 = vector.load %arg1[%c0, %c0_0] : memref<128x5xf32, #tpu.memory_space<vmem>>, vector<128x5xf32>
    %c0_1 = arith.constant 0 : index
    %c0_2 = arith.constant 0 : index
    %c0_3 = arith.constant 0 : index
    %1 = vector.load %arg5[%c0_1, %c0_2, %c0_3] : memref<4x32x5xf32, #tpu.memory_space<vmem>>, vector<1x32x5xf32>
    %2 = vector.shape_cast %1 : vector<1x32x5xf32> to vector<32x5xf32>
    %cst = arith.constant dense<0.000000e+00> : vector<128x32xf32>
    %3 = tpu.matmul %0, %2, %cst {dimension_numbers = #tpu.dot_dimension_numbers<[1], [1], [0], [0], [0, 0, 1, 0], [], []>} : vector<128x5xf32>, vector<32x5xf32>, vector<128x32xf32> -> vector<128x32xf32>
    %c0_4 = arith.constant 0 : index
    %c0_5 = arith.constant 0 : index
    %4 = vector.load %arg2[%c0_4, %c0_5] : memref<128x5xf32, #tpu.memory_space<vmem>>, vector<128x5xf32>
    %c1 = arith.constant 1 : index
    %c0_6 = arith.constant 0 : index
    %c0_7 = arith.constant 0 : index
    %5 = vector.load %arg5[%c1, %c0_6, %c0_7] : memref<4x32x5xf32, #tpu.memory_space<vmem>>, vector<1x32x5xf32>
    %6 = vector.shape_cast %5 : vector<1x32x5xf32> to vector<32x5xf32>
    %cst_8 = arith.constant dense<0.000000e+00> : vector<128x32xf32>
    %7 = tpu.matmul %4, %6, %cst_8 {dimension_numbers = #tpu.dot_dimension_numbers<[1], [1], [0], [0], [0, 0, 1, 0], [], []>} : vector<128x5xf32>, vector<32x5xf32>, vector<128x32xf32> -> vector<128x32xf32>
    %8 = arith.addf %3, %7 : vector<128x32xf32>
    %c0_9 = arith.constant 0 : index
    %c0_10 = arith.constant 0 : index
    %9 = vector.load %arg3[%c0_9, %c0_10] : memref<128x5xf32, #tpu.memory_space<vmem>>, vector<128x5xf32>
    %c2 = arith.constant 2 : index
    %c0_11 = arith.constant 0 : index
    %c0_12 = arith.constant 0 : index
    %10 = vector.load %arg5[%c2, %c0_11, %c0_12] : memref<4x32x5xf32, #tpu.memory_space<vmem>>, vector<1x32x5xf32>
    %11 = vector.shape_cast %10 : vector<1x32x5xf32> to vector<32x5xf32>
    %cst_13 = arith.constant dense<0.000000e+00> : vector<128x32xf32>
    %12 = tpu.matmul %9, %11, %cst_13 {dimension_numbers = #tpu.dot_dimension_numbers<[1], [1], [0], [0], [0, 0, 1, 0], [], []>} : vector<128x5xf32>, vector<32x5xf32>, vector<128x32xf32> -> vector<128x32xf32>
    %13 = arith.addf %8, %12 : vector<128x32xf32>
    %c0_14 = arith.constant 0 : index
    %c0_15 = arith.constant 0 : index
    %14 = vector.load %arg4[%c0_14, %c0_15] : memref<128x10xf32, #tpu.memory_space<vmem>>, vector<128x5xf32>
    %c3 = arith.constant 3 : index
    %c0_16 = arith.constant 0 : index
    %c0_17 = arith.constant 0 : index
    %15 = vector.load %arg5[%c3, %c0_16, %c0_17] : memref<4x32x5xf32, #tpu.memory_space<vmem>>, vector<1x32x5xf32>
    %16 = vector.shape_cast %15 : vector<1x32x5xf32> to vector<32x5xf32>
    %cst_18 = arith.constant dense<0.000000e+00> : vector<128x32xf32>
    %17 = tpu.matmul %14, %16, %cst_18 {dimension_numbers = #tpu.dot_dimension_numbers<[1], [1], [0], [0], [0, 0, 1, 0], [], []>} : vector<128x5xf32>, vector<32x5xf32>, vector<128x32xf32> -> vector<128x32xf32>
    %18 = arith.addf %13, %17 : vector<128x32xf32>
    %c0_19 = arith.constant 0 : index
    %c0_20 = arith.constant 0 : index
    %19 = vector.load %arg6[%c0_19, %c0_20] : memref<1x32xf32, #tpu.memory_space<vmem>>, vector<1x32xf32>
    %20 = vector.broadcast %19 : vector<1x32xf32> to vector<128x32xf32>
    %21 = arith.addf %18, %20 : vector<128x32xf32>
    %cst_21 = arith.constant 0.000000e+00 : f32
    %22 = vector.broadcast %cst_21 : f32 to vector<128x32xf32>
    %23 = arith.maximumf %21, %22 : vector<128x32xf32>
    %c0_22 = arith.constant 0 : index
    %c0_23 = arith.constant 0 : index
    %24 = vector.load %arg7[%c0_22, %c0_23] : memref<32x32xf32, #tpu.memory_space<vmem>>, vector<32x32xf32>
    %cst_24 = arith.constant dense<0.000000e+00> : vector<128x32xf32>
    %25 = tpu.matmul %23, %24, %cst_24 {dimension_numbers = #tpu.dot_dimension_numbers<[1], [1], [0], [0], [0, 0, 1, 0], [], []>} : vector<128x32xf32>, vector<32x32xf32>, vector<128x32xf32> -> vector<128x32xf32>
    %c0_25 = arith.constant 0 : index
    %c0_26 = arith.constant 0 : index
    %26 = vector.load %arg8[%c0_25, %c0_26] : memref<1x32xf32, #tpu.memory_space<vmem>>, vector<1x32xf32>
    %27 = vector.broadcast %26 : vector<1x32xf32> to vector<128x32xf32>
    %28 = arith.addf %25, %27 : vector<128x32xf32>
    %cst_27 = arith.constant 0.000000e+00 : f32
    %29 = vector.broadcast %cst_27 : f32 to vector<128x32xf32>
    %30 = arith.maximumf %28, %29 : vector<128x32xf32>
    %c0_28 = arith.constant 0 : index
    %c0_29 = arith.constant 0 : index
    %31 = vector.load %arg9[%c0_28, %c0_29] : memref<30x32xf32, #tpu.memory_space<vmem>>, vector<30x32xf32>
    %cst_30 = arith.constant dense<0.000000e+00> : vector<128x30xf32>
    %32 = tpu.matmul %30, %31, %cst_30 {dimension_numbers = #tpu.dot_dimension_numbers<[1], [1], [0], [0], [0, 0, 1, 0], [], []>} : vector<128x32xf32>, vector<30x32xf32>, vector<128x30xf32> -> vector<128x30xf32>
    %c0_31 = arith.constant 0 : index
    %c0_32 = arith.constant 0 : index
    %33 = vector.load %arg10[%c0_31, %c0_32] : memref<1x30xf32, #tpu.memory_space<vmem>>, vector<1x30xf32>
    %34 = vector.broadcast %33 : vector<1x30xf32> to vector<128x30xf32>
    %35 = arith.addf %32, %34 : vector<128x30xf32>
    %c0_33 = arith.constant 0 : index
    %c0_34 = arith.constant 0 : index
    %36 = vector.load %arg11[%c0_33, %c0_34] : memref<128x30xf32, #tpu.memory_space<vmem>>, vector<128x30xf32>
    tpu.vector_store %arg11[%c0_33, %c0_34], %35 {strides = array<i32>} : memref<128x30xf32, #tpu.memory_space<vmem>>, vector<128x30xf32>,
    return
  }
  func.func @transform_0(%arg0: i32) -> (i32, i32) {
    %c0_i32 = arith.constant 0 : i32
    %c0_i32_0 = arith.constant 0 : i32
    return %arg0, %c0_i32 : i32, i32
  }
  func.func @transform_1(%arg0: i32) -> (i32, i32) {
    %c0_i32 = arith.constant 0 : i32
    %c0_i32_0 = arith.constant 0 : i32
    return %arg0, %c0_i32 : i32, i32
  }
  func.func @transform_2(%arg0: i32) -> (i32, i32) {
    %c0_i32 = arith.constant 0 : i32
    %c0_i32_0 = arith.constant 0 : i32
    return %arg0, %c0_i32 : i32, i32
  }
  func.func @transform_3(%arg0: i32) -> (i32, i32) {
    %c0_i32 = arith.constant 0 : i32
    %c0_i32_0 = arith.constant 0 : i32
    return %arg0, %c0_i32 : i32, i32
  }
  func.func @transform_4(%arg0: i32) -> (i32, i32, i32) {
    %c0_i32 = arith.constant 0 : i32
    %c0_i32_0 = arith.constant 0 : i32
    %c0_i32_1 = arith.constant 0 : i32
    %c0_i32_2 = arith.constant 0 : i32
    return %c0_i32, %c0_i32_0, %c0_i32_1 : i32, i32, i32
  }
  func.func @transform_5(%arg0: i32) -> (i32, i32) {
    %c0_i32 = arith.constant 0 : i32
    %c0_i32_0 = arith.constant 0 : i32
    %c0_i32_1 = arith.constant 0 : i32
    return %c0_i32, %c0_i32_0 : i32, i32
  }
  func.func @transform_6(%arg0: i32) -> (i32, i32) {
    %c0_i32 = arith.constant 0 : i32
    %c0_i32_0 = arith.constant 0 : i32
    %c0_i32_1 = arith.constant 0 : i32
    return %c0_i32, %c0_i32_0 : i32, i32
  }
  func.func @transform_7(%arg0: i32) -> (i32, i32) {
    %c0_i32 = arith.constant 0 : i32
    %c0_i32_0 = arith.constant 0 : i32
    %c0_i32_1 = arith.constant 0 : i32
    return %c0_i32, %c0_i32_0 : i32, i32
  }
  func.func @transform_8(%arg0: i32) -> (i32, i32) {
    %c0_i32 = arith.constant 0 : i32
    %c0_i32_0 = arith.constant 0 : i32
    %c0_i32_1 = arith.constant 0 : i32
    return %c0_i32, %c0_i32_0 : i32, i32
  }
  func.func @transform_9(%arg0: i32) -> (i32, i32) {
    %c0_i32 = arith.constant 0 : i32
    %c0_i32_0 = arith.constant 0 : i32
    %c0_i32_1 = arith.constant 0 : i32
    return %c0_i32, %c0_i32_0 : i32, i32
  }
  func.func @transform_10(%arg0: i32) -> (i32, i32) {
    %c0_i32 = arith.constant 0 : i32
    %c0_i32_0 = arith.constant 0 : i32
    return %arg0, %c0_i32 : i32, i32
  }
}

</mosaic_0001>

<bundles_post_ra>
// kernel: dpc_policy_forward.1
= control target key start
LH: loop header
LB: loop body
LE: loop exit
PB: predicated region body
PF: predicated region fallthrough
CT: control target
= control target key end

     0   :  { %vm76_vm0 = vcmask 39936   ;;  %vm1021_vm1 = vcmask 261120   ;;  %vm1459_vm2 = vcmask 244736   ;;  %s2505_s0 = inlined_call_operand.vmem [shape: f32[8,5], index: 0, kind: input, shape index: {}]   ;;  %s2506_s1 = inlined_call_operand.vmem [shape: f32[8,5], index: 1, kind: input, shape index: {}]   ;;  %s2507_s2 = inlined_call_operand.vmem [shape: f32[8,5], index: 2, kind: input, shape index: {}]   ;;  %s2508_s3 = inlined_call_operand.vmem [shape: f32[8,10], index: 3, kind: input, shape index: {}]   ;;  %s2509_s4 = inlined_call_operand.vmem [shape: f32[4,32,5], index: 4, kind: input, shape index: {}]   ;;  %s2510_s5 = inlined_call_operand.vmem [shape: f32[1,32], index: 5, kind: input, shape index: {}]   ;;  %s2511_s6 = inlined_call_operand.vmem [shape: f32[32,32], index: 6, kind: input, shape index: {}]   ;;  %s2512_s7 = inlined_call_operand.vmem [shape: f32[1,32], index: 7, kind: input, shape index: {}]   ;;  %s2513_s8 = inlined_call_operand.vmem [shape: f32[30,32], index: 8, kind: input, shape index: {}]   ;;  %s2514_s9 = inlined_call_operand.vmem [shape: f32[1,30], index: 9, kind: input, shape index: {}]   ;;  %s2515_s10 = inlined_call_operand.vmem [shape: f32[8,30], index: 10, kind: output, shape index: {}]  }
   0x1   :  { %v1520_v0 = vld [vmem:[%s2509_s4 + $0x38] sm:$0xff]  ;;  %v1519_v2 = vld [vmem:[%s2509_s4 + $0x30] sm:$0xff]  ;;  %v55_v4 = vld [vmem:[%s2506_s1] sm:$0xff] }
   0x2   :  { %v54_v1 = vld [vmem:[%s2509_s4 + $0x18] sm:$0xff]  ;;  %1772 = vmatprep.subr.msk.mxu0 %vm76_vm0, %v1520_v0  ;;  %v53_v3 = vld [vmem:[%s2509_s4 + $0x10] sm:$0xff]  ;;  %v35_v5 = vld [vmem:[%s2505_s0] sm:$0xff]  ;;  %1780 = vmatprep.mubr.msk.f32.mxu0 %vm76_vm0, %v55_v4 }
   0x3   :  { %1804 = vmatprep.subr.msk.mxu1 %vm76_vm0, %v54_v1  ;;  %1773 = vmatpush3.xpose.msk.msra.mxu0 %vm76_vm0, %v1520_v0  ;;  %v1518_v6 = vld [vmem:[%s2509_s4 + $0x28] sm:$0xff]  ;;  %v1517_v8 = vld [vmem:[%s2509_s4 + $0x20] sm:$0xff]  ;;  %v1564_v10 = vld [vmem:[%s2509_s4 + $0x58] sm:$0xff] }
   0x4   :  { %1805 = vmatpush3.xpose.msk.msra.mxu1 %vm76_vm0, %v54_v1  ;;  %1774 = vmatprep.subr.msk.mxu0 %vm76_vm0, %v1519_v2  ;;  %v52_v7 = vld [vmem:[%s2509_s4 + $0x8] sm:$0xff]  ;;  %v51_v9 = vld [vmem:[%s2509_s4] sm:$0xff]  ;;  %v1588_v11 = vld [vmem:[%s2509_s4 + $0x78] sm:$0xff] }
   0x5   :  { %1806 = vmatprep.subr.msk.mxu1 %vm76_vm0, %v53_v3  ;;  %1812 = vmatprep.mubr.msk.f32.mxu1 %vm76_vm0, %v35_v5  ;;  %v56_v12 = vld [vmem:[%s2506_s1 + $0x8] sm:$0xff]  ;;  %v57_v14 = vld [vmem:[%s2506_s1 + $0x10] sm:$0xff]  ;;  %v58_v18 = vld [vmem:[%s2506_s1 + $0x18] sm:$0xff] }
   0x6   :  { %v36_v13 = vld [vmem:[%s2505_s0 + $0x8] sm:$0xff]  ;;  %v37_v15 = vld [vmem:[%s2505_s0 + $0x10] sm:$0xff]  ;;  %v38_v19 = vld [vmem:[%s2505_s0 + $0x18] sm:$0xff] }
   0x7   :  { %1775 = vmatpush3.xpose.msk.msra.mxu0 %vm76_vm0, %v1519_v2  ;;  %v1563_v16 = vld [vmem:[%s2509_s4 + $0x50] sm:$0xff]  ;;  %v59_v20 = vld [vmem:[%s2506_s1 + $0x20] sm:$0xff]  ;;  %v1562_v22 = vld [vmem:[%s2509_s4 + $0x48] sm:$0xff] }
   0x8   :  { %1807 = vmatpush3.xpose.msk.msra.mxu1 %vm76_vm0, %v53_v3  ;;  %1776 = vmatprep.subr.msk.mxu0 %vm76_vm0, %v1518_v6  ;;  %v1587_v17 = vld [vmem:[%s2509_s4 + $0x70] sm:$0xff]  ;;  %v39_v21 = vld [vmem:[%s2505_s0 + $0x20] sm:$0xff]  ;;  %v1586_v23 = vld [vmem:[%s2509_s4 + $0x68] sm:$0xff] }
   0x9   :  { %1808 = vmatprep.subr.msk.mxu1 %vm76_vm0, %v52_v7  ;;  %v60_v24 = vld [vmem:[%s2506_s1 + $0x28] sm:$0xff]  ;;  %v61_v26 = vld [vmem:[%s2506_s1 + $0x30] sm:$0xff]  ;;  %v1561_v28 = vld [vmem:[%s2509_s4 + $0x40] sm:$0xff] }
   0xa   :  { %v40_v25 = vld [vmem:[%s2505_s0 + $0x28] sm:$0xff]  ;;  %v41_v27 = vld [vmem:[%s2505_s0 + $0x30] sm:$0xff]  ;;  %v1585_v29 = vld [vmem:[%s2509_s4 + $0x60] sm:$0xff] }
   0xb   :  { %1777 = vmatpush3.xpose.msk.msra.mxu0 %vm76_vm0, %v1518_v6  ;;  %v62_v30 = vld [vmem:[%s2506_s1 + $0x38] sm:$0xff]  ;;  %v63_v32 = vld [vmem:[%s2506_s1 + $0x40] sm:$0xff]  ;;  %v64_v34 = vld [vmem:[%s2506_s1 + $0x48] sm:$0xff] }
   0xc   :  { %1809 = vmatpush3.xpose.msk.msra.mxu1 %vm76_vm0, %v52_v7  ;;  %1778 = vmatprep.subr.msk.mxu0 %vm76_vm0, %v1517_v8  ;;  %v42_v31 = vld [vmem:[%s2505_s0 + $0x38] sm:$0xff]  ;;  %v43_v33 = vld [vmem:[%s2505_s0 + $0x40] sm:$0xff]  ;;  %v44_v35 = vld [vmem:[%s2505_s0 + $0x48] sm:$0xff] }
   0xd   :  { %1810 = vmatprep.subr.msk.mxu1 %vm76_vm0, %v51_v9  ;;  %v65_v36 = vld [vmem:[%s2506_s1 + $0x50] sm:$0xff]  ;;  %v66_v38 = vld [vmem:[%s2506_s1 + $0x58] sm:$0xff]  ;;  %v67_v40 = vld [vmem:[%s2506_s1 + $0x60] sm:$0xff] }
   0xe   :  { %v45_v37 = vld [vmem:[%s2505_s0 + $0x50] sm:$0xff]  ;;  %v46_v39 = vld [vmem:[%s2505_s0 + $0x58] sm:$0xff]  ;;  %v47_v41 = vld [vmem:[%s2505_s0 + $0x60] sm:$0xff] }
   0xf   :  { %1779 = vmatpush3.xpose.msk.msra.mxu0 %vm76_vm0, %v1517_v8  ;;  %v68_v42 = vld [vmem:[%s2506_s1 + $0x68] sm:$0xff]  ;;  %v69_v44 = vld [vmem:[%s2506_s1 + $0x70] sm:$0xff]  ;;  %v70_v46 = vld [vmem:[%s2506_s1 + $0x78] sm:$0xff] }
  0x10   :  { %1811 = vmatpush3.xpose.msk.msra.mxu1 %vm76_vm0, %v51_v9  ;;  %1836 = vmatprep.subr.msk.mxu0 %vm76_vm0, %v1564_v10  ;;  %v48_v43 = vld [vmem:[%s2505_s0 + $0x68] sm:$0xff]  ;;  %v49_v45 = vld [vmem:[%s2505_s0 + $0x70] sm:$0xff]  ;;  %v50_v47 = vld [vmem:[%s2505_s0 + $0x78] sm:$0xff] }
  0x11   :  { %1868 = vmatprep.subr.msk.mxu1 %vm76_vm0, %v1588_v11  ;;  %v487_v48 = vld [vmem:[%s2507_s2] sm:$0xff]  ;;  %v488_v50 = vld [vmem:[%s2507_s2 + $0x8] sm:$0xff]  ;;  %v489_v52 = vld [vmem:[%s2507_s2 + $0x10] sm:$0xff] }
  0x12   :  { %1781 = vmatmul.mubr.msk.f32.vlgmr.msra.gmra.mxu0 %vm76_vm0, %v56_v12  ;;  %v729_v49 = vld [vmem:[%s2508_s3] sm:$0xff]  ;;  %v730_v51 = vld [vmem:[%s2508_s3 + $0x8] sm:$0xff]  ;;  %v731_v53 = vld [vmem:[%s2508_s3 + $0x10] sm:$0xff] }
  0x13   :  { %1813 = vmatmul.mubr.msk.f32.vlgmr.msra.gmra.mxu1 %vm76_vm0, %v36_v13  ;;  %1837 = vmatpush3.xpose.msk.msra.mxu0 %vm76_vm0, %v1564_v10  ;;  %v490_v54 = vld [vmem:[%s2507_s2 + $0x18] sm:$0xff]  ;;  %v491_v56 = vld [vmem:[%s2507_s2 + $0x20] sm:$0xff]  ;;  %v492_v58 = vld [vmem:[%s2507_s2 + $0x28] sm:$0xff] }
  0x14   :  { %1783 = vmatprep.mubr.msk.f32.mxu0 %vm76_vm0, %v57_v14  ;;  %1815 = vmatprep.mubr.msk.f32.mxu1 %vm76_vm0, %v37_v15  ;;  %v732_v55 = vld [vmem:[%s2508_s3 + $0x18] sm:$0xff]  ;;  %v733_v57 = vld [vmem:[%s2508_s3 + $0x20] sm:$0xff]  ;;  %v734_v59 = vld [vmem:[%s2508_s3 + $0x28] sm:$0xff] }
  0x15   :  { %1869 = vmatpush3.xpose.msk.msra.mxu1 %vm76_vm0, %v1588_v11  ;;  %1838 = vmatprep.subr.msk.mxu0 %vm76_vm0, %v1563_v16  ;;  %v493_v60 = vld [vmem:[%s2507_s2 + $0x30] sm:$0xff]  ;;  %v494_v62 = vld [vmem:[%s2507_s2 + $0x38] sm:$0xff]  ;;  %v495_v0 = vld [vmem:[%s2507_s2 + $0x40] sm:$0xff] }
  0x16   :  { %1870 = vmatprep.subr.msk.mxu1 %vm76_vm0, %v1587_v17  ;;  %1784 = vmatmul.mubr.msk.f32.gmra.mxu0 %vm76_vm0, %v58_v18  ;;  %v735_v61 = vld [vmem:[%s2508_s3 + $0x30] sm:$0xff]  ;;  %v736_v63 = vld [vmem:[%s2508_s3 + $0x38] sm:$0xff]  ;;  %v737_v1 = vld [vmem:[%s2508_s3 + $0x40] sm:$0xff] }
  0x17   :  { %1816 = vmatmul.mubr.msk.f32.gmra.mxu1 %vm76_vm0, %v38_v19  ;;  %1786 = vmatprep.mubr.msk.f32.mxu0 %vm76_vm0, %v59_v20  ;;  %v496_v2 = vld [vmem:[%s2507_s2 + $0x48] sm:$0xff]  ;;  %v497_v4 = vld [vmem:[%s2507_s2 + $0x50] sm:$0xff]  ;;  %v498_v6 = vld [vmem:[%s2507_s2 + $0x58] sm:$0xff] }
  0x18   :  { %1818 = vmatprep.mubr.msk.f32.mxu1 %vm76_vm0, %v39_v21  ;;  %1839 = vmatpush3.xpose.msk.msra.mxu0 %vm76_vm0, %v1563_v16  ;;  %v738_v3 = vld [vmem:[%s2508_s3 + $0x48] sm:$0xff]  ;;  %v739_v5 = vld [vmem:[%s2508_s3 + $0x50] sm:$0xff]  ;;  %v740_v7 = vld [vmem:[%s2508_s3 + $0x58] sm:$0xff] }
  0x19   :  { %1871 = vmatpush3.xpose.msk.msra.mxu1 %vm76_vm0, %v1587_v17  ;;  %1840 = vmatprep.subr.msk.mxu0 %vm76_vm0, %v1562_v22  ;;  %v499_v8 = vld [vmem:[%s2507_s2 + $0x60] sm:$0xff]  ;;  %v500_v10 = vld [vmem:[%s2507_s2 + $0x68] sm:$0xff]  ;;  %v501_v12 = vld [vmem:[%s2507_s2 + $0x70] sm:$0xff] }
  0x1a   :  { %1872 = vmatprep.subr.msk.mxu1 %vm76_vm0, %v1586_v23  ;;  %1787 = vmatmul.mubr.msk.f32.gmra.mxu0 %vm76_vm0, %v60_v24  ;;  %v741_v9 = vld [vmem:[%s2508_s3 + $0x60] sm:$0xff]  ;;  %v742_v11 = vld [vmem:[%s2508_s3 + $0x68] sm:$0xff]  ;;  %v743_v13 = vld [vmem:[%s2508_s3 + $0x70] sm:$0xff] }
  0x1b   :  { %1819 = vmatmul.mubr.msk.f32.gmra.mxu1 %vm76_vm0, %v40_v25  ;;  %1789 = vmatprep.mubr.msk.f32.mxu0 %vm76_vm0, %v61_v26  ;;  %v502_v14 = vld [vmem:[%s2507_s2 + $0x78] sm:$0xff]  ;;  %v1012_v17 = vld [vmem:[%s2511_s6 + $0x10] sm:$0xff]  ;;  %v1011_v18 = vld [vmem:[%s2511_s6 + $0x8] sm:$0xff] }
  0x1c   :  { %1821 = vmatprep.mubr.msk.f32.mxu1 %vm76_vm0, %v41_v27  ;;  %1841 = vmatpush3.xpose.msk.msra.mxu0 %vm76_vm0, %v1562_v22  ;;  %v744_v15 = vld [vmem:[%s2508_s3 + $0x78] sm:$0xff]  ;;  %v1010_v19 = vld [vmem:[%s2511_s6] sm:$0xff]  ;;  %v1245_v21 = vld [vmem:[%s2513_s8 + $0x10] sm:$0xff] }
  0x1d   :  { %1873 = vmatpush3.xpose.msk.msra.mxu1 %vm76_vm0, %v1586_v23  ;;  %1842 = vmatprep.subr.msk.mxu0 %vm76_vm0, %v1561_v28  ;;  %v1013_v16 = vld [vmem:[%s2511_s6 + $0x18] sm:$0xff]  ;;  %v1244_v22 = vld [vmem:[%s2513_s8 + $0x8] sm:$0xff] }
  0x1e   :  { %1874 = vmatprep.subr.msk.mxu1 %vm76_vm0, %v1585_v29  ;;  %1790 = vmatmul.mubr.msk.f32.gmra.mxu0 %vm76_vm0, %v62_v30  ;;  %v1246_v20 = vld [vmem:[%s2513_s8 + $0x18] sm:$0x3f] }
  0x1f   :  { %1822 = vmatmul.mubr.msk.f32.gmra.mxu1 %vm76_vm0, %v42_v31  ;;  %1792 = vmatprep.mubr.msk.f32.mxu0 %vm76_vm0, %v63_v32 }
  0x20   :  { %1824 = vmatprep.mubr.msk.f32.mxu1 %vm76_vm0, %v43_v33  ;;  %1843 = vmatpush3.xpose.msk.msra.mxu0 %vm76_vm0, %v1561_v28 }
  0x21   :  { %1875 = vmatpush3.xpose.msk.msra.mxu1 %vm76_vm0, %v1585_v29  ;;  %1900 = vmatprep.subr.msk.mxu0 %vm1021_vm1, %v1013_v16 }
  0x22   :  { %1793 = vmatmul.mubr.msk.f32.gmra.mxu0 %vm76_vm0, %v64_v34  ;;  %1932 = vmatprep.subr.msk.mxu1 %vm1021_vm1, %v1246_v20 }
  0x23   :  { %1825 = vmatmul.mubr.msk.f32.gmra.mxu1 %vm76_vm0, %v44_v35  ;;  %1795 = vmatprep.mubr.msk.f32.mxu0 %vm76_vm0, %v65_v36 }
  0x24   :  { %1827 = vmatprep.mubr.msk.f32.mxu1 %vm76_vm0, %v45_v37 }
  0x26   :  { %1796 = vmatmul.mubr.msk.f32.gmra.mxu0 %vm76_vm0, %v66_v38 }
  0x27   :  { %1828 = vmatmul.mubr.msk.f32.gmra.mxu1 %vm76_vm0, %v46_v39  ;;  %1798 = vmatprep.mubr.msk.f32.mxu0 %vm76_vm0, %v67_v40 }
  0x28   :  { %1830 = vmatprep.mubr.msk.f32.mxu1 %vm76_vm0, %v47_v41 }
  0x2a   :  { %1799 = vmatmul.mubr.msk.f32.gmra.mxu0 %vm76_vm0, %v68_v42 }
  0x2b   :  { %1831 = vmatmul.mubr.msk.f32.gmra.mxu1 %vm76_vm0, %v48_v43  ;;  %1801 = vmatprep.mubr.msk.f32.mxu0 %vm76_vm0, %v69_v44 }
  0x2c   :  { %1833 = vmatprep.mubr.msk.f32.mxu1 %vm76_vm0, %v49_v45 }
  0x2e   :  { %1802 = vmatmul.mubr.msk.f32.gmra.mxu0 %vm76_vm0, %v70_v46 }
  0x2f   :  { %1834 = vmatmul.mubr.msk.f32.gmra.mxu1 %vm76_vm0, %v50_v47  ;;  %1844 = vmatprep.mubr.msk.f32.mxu0 %vm76_vm0, %v487_v48 }
  0x30   :  { %1876 = vmatprep.mubr.msk.f32.mxu1 %vm76_vm0, %v729_v49 }
  0x32   :  { %1845 = vmatmul.mubr.msk.f32.vlgmr.msra.gmra.mxu0 %vm76_vm0, %v488_v50 }
  0x33   :  { %1877 = vmatmul.mubr.msk.f32.vlgmr.msra.gmra.mxu1 %vm76_vm0, %v730_v51  ;;  %1847 = vmatprep.mubr.msk.f32.mxu0 %vm76_vm0, %v489_v52 }
  0x34   :  { %1879 = vmatprep.mubr.msk.f32.mxu1 %vm76_vm0, %v731_v53  ;;  %1901 = vmatpush3.xpose.msk.msra.mxu0 %vm1021_vm1, %v1013_v16 }
  0x35   :  { %1902 = vmatprep.subr.msk.mxu0 %vm1021_vm1, %v1012_v17  ;;  %1933 = vmatpush3.xpose.msk.msra.mxu1 %vm1021_vm1, %v1246_v20 }
  0x36   :  { %1848 = vmatmul.mubr.msk.f32.gmra.mxu0 %vm76_vm0, %v490_v54  ;;  %1934 = vmatprep.subr.msk.mxu1 %vm1021_vm1, %v1245_v21 }
  0x37   :  { %1880 = vmatmul.mubr.msk.f32.gmra.mxu1 %vm76_vm0, %v732_v55  ;;  %1850 = vmatprep.mubr.msk.f32.mxu0 %vm76_vm0, %v491_v56 }
  0x38   :  { %1882 = vmatprep.mubr.msk.f32.mxu1 %vm76_vm0, %v733_v57  ;;  %1903 = vmatpush3.xpose.msk.msra.mxu0 %vm1021_vm1, %v1012_v17 }
  0x39   :  { %1904 = vmatprep.subr.msk.mxu0 %vm1021_vm1, %v1011_v18  ;;  %1935 = vmatpush3.xpose.msk.msra.mxu1 %vm1021_vm1, %v1245_v21 }
  0x3a   :  { %1851 = vmatmul.mubr.msk.f32.gmra.mxu0 %vm76_vm0, %v492_v58  ;;  %1936 = vmatprep.subr.msk.mxu1 %vm1021_vm1, %v1244_v22 }
  0x3b   :  { %1883 = vmatmul.mubr.msk.f32.gmra.mxu1 %vm76_vm0, %v734_v59  ;;  %1853 = vmatprep.mubr.msk.f32.mxu0 %vm76_vm0, %v493_v60 }
  0x3c   :  { %1885 = vmatprep.mubr.msk.f32.mxu1 %vm76_vm0, %v735_v61  ;;  %1905 = vmatpush3.xpose.msk.msra.mxu0 %vm1021_vm1, %v1011_v18 }
  0x3d   :  { %1906 = vmatprep.subr.msk.mxu0 %vm1021_vm1, %v1010_v19  ;;  %1937 = vmatpush3.xpose.msk.msra.mxu1 %vm1021_vm1, %v1244_v22 }
  0x3e   :  { %1854 = vmatmul.mubr.msk.f32.gmra.mxu0 %vm76_vm0, %v494_v62 }
  0x3f   :  { %1886 = vmatmul.mubr.msk.f32.gmra.mxu1 %vm76_vm0, %v736_v63  ;;  %1856 = vmatprep.mubr.msk.f32.mxu0 %vm76_vm0, %v495_v0  ;;  %v2425_v0 = vld [vmem:[%s2510_s5] ss:$0 sm:$0xff] }
  0x40   :  { %1888 = vmatprep.mubr.msk.f32.mxu1 %vm76_vm0, %v737_v1  ;;  %1907 = vmatpush3.xpose.msk.msra.mxu0 %vm1021_vm1, %v1010_v19 }
  0x42   :  { %1857 = vmatmul.mubr.msk.f32.gmra.mxu0 %vm76_vm0, %v496_v2 }
  0x43   :  { %1889 = vmatmul.mubr.msk.f32.gmra.mxu1 %vm76_vm0, %v738_v3  ;;  %1859 = vmatprep.mubr.msk.f32.mxu0 %vm76_vm0, %v497_v4 }
  0x44   :  { %1891 = vmatprep.mubr.msk.f32.mxu1 %vm76_vm0, %v739_v5 }
  0x46   :  { %1860 = vmatmul.mubr.msk.f32.gmra.mxu0 %vm76_vm0, %v498_v6 }
  0x47   :  { %1892 = vmatmul.mubr.msk.f32.gmra.mxu1 %vm76_vm0, %v740_v7  ;;  %1862 = vmatprep.mubr.msk.f32.mxu0 %vm76_vm0, %v499_v8 }
  0x48   :  { %1894 = vmatprep.mubr.msk.f32.mxu1 %vm76_vm0, %v741_v9 }
  0x4a   :  { %1863 = vmatmul.mubr.msk.f32.gmra.mxu0 %vm76_vm0, %v500_v10 }
  0x4b   :  { %1895 = vmatmul.mubr.msk.f32.gmra.mxu1 %vm76_vm0, %v742_v11  ;;  %1865 = vmatprep.mubr.msk.f32.mxu0 %vm76_vm0, %v501_v12 }
  0x4c   :  { %1897 = vmatprep.mubr.msk.f32.mxu1 %vm76_vm0, %v743_v13 }
  0x4e   :  { %1866 = vmatmul.mubr.msk.f32.gmra.mxu0 %vm76_vm0, %v502_v14 }
  0x4f   :  { %1898 = vmatmul.mubr.msk.f32.gmra.mxu1 %vm76_vm0, %v744_v15 }
  0xd2   :  { %v1782_v23 = vpop.f32.mrf.mxu0 }
  0xd3   :  { %v1814_v24 = vpop.f32.mrf.mxu1 }
  0xd4   :  { %v203_v25 = vpop.f32.mrf.mxu0  ;;  %v414_v55 = vadd.f32 %v1814_v24, %v1782_v23 }
  0xd5   :  { %v408_v26 = vpop.f32.mrf.mxu1 }
  0xd6   :  { %v1785_v27 = vpop.f32.mrf.mxu0  ;;  %v409_v58 = vadd.f32 %v408_v26, %v203_v25 }
  0xd7   :  { %v1817_v28 = vpop.f32.mrf.mxu1 }
  0xd8   :  { %v213_v29 = vpop.f32.mrf.mxu0  ;;  %v424_v62 = vadd.f32 %v1817_v28, %v1785_v27 }
  0xd9   :  { %v418_v30 = vpop.f32.mrf.mxu1 }
  0xda   :  { %v1788_v31 = vpop.f32.mrf.mxu0  ;;  %v419_v4 = vadd.f32 %v418_v30, %v213_v29 }
  0xdb   :  { %v1820_v32 = vpop.f32.mrf.mxu1 }
  0xdc   :  { %v223_v33 = vpop.f32.mrf.mxu0  ;;  %v434_v10 = vadd.f32 %v1820_v32, %v1788_v31 }
  0xdd   :  { %v428_v34 = vpop.f32.mrf.mxu1 }
  0xde   :  { %v1791_v35 = vpop.f32.mrf.mxu0  ;;  %v429_v16 = vadd.f32 %v428_v34, %v223_v33 }
  0xdf   :  { %v1823_v36 = vpop.f32.mrf.mxu1 }
  0xe0   :  { %v233_v37 = vpop.f32.mrf.mxu0  ;;  %v444_v24 = vadd.f32 %v1823_v36, %v1791_v35 }
  0xe1   :  { %v438_v38 = vpop.f32.mrf.mxu1 }
  0xe2   :  { %v2390_v39 = vpop.f32.mrf.mxu0  ;;  %v439_v30 = vadd.f32 %v438_v38, %v233_v37 }
  0xe3   :  { %v2392_v40 = vpop.f32.mrf.mxu1 }
  0xe4   :  { %v2394_v41 = vpop.f32.mrf.mxu0  ;;  %v454_v35 = vadd.f32 %v2392_v40, %v2390_v39 }
  0xe5   :  { %v2396_v42 = vpop.f32.mrf.mxu1 }
  0xe6   :  { %v2398_v43 = vpop.f32.mrf.mxu0  ;;  %v449_v38 = vadd.f32 %v2396_v42, %v2394_v41 }
  0xe7   :  { %v2400_v44 = vpop.f32.mrf.mxu1 }
  0xe8   :  { %v2402_v45 = vpop.f32.mrf.mxu0 }
  0xe9   :  { %v2404_v46 = vpop.f32.mrf.mxu1 }
  0xea   :  { %v2406_v47 = vpop.f32.mrf.mxu0  ;;  %v459_v42 = vadd.f32 %v2404_v46, %v2402_v45 }
  0xeb   :  { %v2408_v48 = vpop.f32.mrf.mxu1 }
  0xec   :  { %v2410_v49 = vpop.f32.mrf.mxu0 }
  0xed   :  { %v2412_v50 = vpop.f32.mrf.mxu1 }
  0xee   :  { %v2414_v51 = vpop.f32.mrf.mxu0  ;;  %v469_v46 = vadd.f32 %v2412_v50, %v2410_v49 }
  0xef   :  { %v2416_v52 = vpop.f32.mrf.mxu1 }
  0xf0   :  { %v2418_v53 = vpop.f32.mrf.mxu0 }
  0xf1   :  { %v2420_v54 = vpop.f32.mrf.mxu1 }
  0xf2   :  { %v1846_v56 = vpop.f32.mrf.mxu0  ;;  %v479_v50 = vadd.f32 %v2420_v54, %v2418_v53 }
  0xf3   :  { %v1878_v57 = vpop.f32.mrf.mxu1  ;;  %v714_v59 = vadd.f32 %v1846_v56, %v414_v55 }
  0xf4   :  { %v634_v60 = vpop.f32.mrf.mxu0 }
  0xf5   :  { %v876_v61 = vpop.f32.mrf.mxu1  ;;  %v956_v63 = vadd.f32 %v1878_v57, %v714_v59  ;;  %v713_v1 = vadd.f32 %v634_v60, %v409_v58 }
  0xf6   :  { %v1849_v2 = vpop.f32.mrf.mxu0 }
  0xf7   :  { %v1881_v3 = vpop.f32.mrf.mxu1  ;;  %v955_v5 = vadd.f32 %v876_v61, %v713_v1  ;;  %v716_v6 = vadd.f32 %v1849_v2, %v424_v62  ;;  %v979_v7 = vadd.f32 %v2425_v0, %v956_v63 }
  0xf8   :  { %v644_v8 = vpop.f32.mrf.mxu0 }
  0xf9   :  { %v886_v9 = vpop.f32.mrf.mxu1  ;;  %v978_v11 = vadd.f32 %v2425_v0, %v955_v5  ;;  %v958_v12 = vadd.f32 %v1881_v3, %v716_v6  ;;  %v715_v13 = vadd.f32 %v644_v8, %v419_v4  ;;  %v995_v20 = vmax.f32 %v979_v7, 0.0 }
  0xfa   :  { %v1852_v14 = vpop.f32.mrf.mxu0  ;;  %v464_v3 = vadd.f32 %v2400_v44, %v2398_v43 }
  0xfb   :  { %v1884_v15 = vpop.f32.mrf.mxu1  ;;  %v994_v17 = vmax.f32 %v978_v11, 0.0  ;;  %v957_v18 = vadd.f32 %v886_v9, %v715_v13  ;;  %v718_v19 = vadd.f32 %v1852_v14, %v434_v10  ;;  %v981_v21 = vadd.f32 %v2425_v0, %v958_v12 }
  0xfc   :  { %v654_v22 = vpop.f32.mrf.mxu0  ;;  %v474_v13 = vadd.f32 %v2408_v48, %v2406_v47 }
  0xfd   :  { %v896_v23 = vpop.f32.mrf.mxu1  ;;  %v980_v25 = vadd.f32 %v2425_v0, %v957_v18  ;;  %v960_v26 = vadd.f32 %v1884_v15, %v718_v19  ;;  %v717_v27 = vadd.f32 %v654_v22, %v429_v16  ;;  %1908 = vmatprep.mubr.msk.f32.mxu0 %vm1021_vm1, %v994_v17  ;;  %v997_v34 = vmax.f32 %v981_v21, 0.0 }
  0xfe   :  { %v1855_v28 = vpop.f32.mrf.mxu0  ;;  %1909 = vmatmul.mubr.msk.f32.vlgmr.msra.gmra.mxu0 %vm1021_vm1, %v995_v20 }
  0xff   :  { %v1887_v29 = vpop.f32.mrf.mxu1  ;;  %v996_v31 = vmax.f32 %v980_v25, 0.0  ;;  %v959_v32 = vadd.f32 %v896_v23, %v717_v27  ;;  %v720_v33 = vadd.f32 %v1855_v28, %v444_v24  ;;  %v983_v55 = vadd.f32 %v2425_v0, %v960_v26 }
 0x100   :  { %v664_v56 = vpop.f32.mrf.mxu0  ;;  %v484_v23 = vadd.f32 %v2416_v52, %v2414_v51 }
 0x101   :  { %v906_v57 = vpop.f32.mrf.mxu1  ;;  %v982_v36 = vadd.f32 %v2425_v0, %v959_v32  ;;  %v962_v58 = vadd.f32 %v1887_v29, %v720_v33  ;;  %v719_v59 = vadd.f32 %v664_v56, %v439_v30  ;;  %1911 = vmatprep.mubr.msk.f32.mxu0 %vm1021_vm1, %v996_v31  ;;  %v999_v1 = vmax.f32 %v983_v55, 0.0 }
 0x102   :  { %v1858_v60 = vpop.f32.mrf.mxu0  ;;  %1912 = vmatmul.mubr.msk.f32.gmra.mxu0 %vm1021_vm1, %v997_v34 }
 0x103   :  { %v1890_v37 = vpop.f32.mrf.mxu1  ;;  %v998_v61 = vmax.f32 %v982_v36, 0.0  ;;  %v961_v62 = vadd.f32 %v906_v57, %v719_v59  ;;  %v722_v63 = vadd.f32 %v1858_v60, %v454_v35  ;;  %v985_v2 = vadd.f32 %v2425_v0, %v962_v58  ;;  %v1243_v59 = vld [vmem:[%s2513_s8] sm:$0xff] }
 0x104   :  { %v674_v39 = vpop.f32.mrf.mxu0  ;;  %1938 = vmatprep.subr.msk.mxu1 %vm1021_vm1, %v1243_v59 }
 0x105   :  { %v916_v40 = vpop.f32.mrf.mxu1  ;;  %v984_v4 = vadd.f32 %v2425_v0, %v961_v62  ;;  %v964_v5 = vadd.f32 %v1890_v37, %v722_v63  ;;  %v721_v6 = vadd.f32 %v674_v39, %v449_v38  ;;  %1914 = vmatprep.mubr.msk.f32.mxu0 %vm1021_vm1, %v998_v61  ;;  %v1001_v11 = vmax.f32 %v985_v2, 0.0  ;;  %1939 = vmatpush3.xpose.msk.msra.mxu1 %vm1021_vm1, %v1243_v59 }
 0x106   :  { %v1861_v7 = vpop.f32.mrf.mxu0  ;;  %1915 = vmatmul.mubr.msk.f32.gmra.mxu0 %vm1021_vm1, %v999_v1 }
 0x107   :  { %v1893_v41 = vpop.f32.mrf.mxu1  ;;  %v1000_v8 = vmax.f32 %v984_v4, 0.0  ;;  %v963_v9 = vadd.f32 %v916_v40, %v721_v6  ;;  %v724_v10 = vadd.f32 %v1861_v7, %v464_v3  ;;  %v987_v12 = vadd.f32 %v2425_v0, %v964_v5 }
 0x108   :  { %v684_v43 = vpop.f32.mrf.mxu0 }
 0x109   :  { %v926_v44 = vpop.f32.mrf.mxu1  ;;  %v986_v14 = vadd.f32 %v2425_v0, %v963_v9  ;;  %v966_v15 = vadd.f32 %v1893_v41, %v724_v10  ;;  %v723_v16 = vadd.f32 %v684_v43, %v459_v42  ;;  %1917 = vmatprep.mubr.msk.f32.mxu0 %vm1021_vm1, %v1000_v8  ;;  %v1003_v21 = vmax.f32 %v987_v12, 0.0 }
 0x10a   :  { %v1864_v17 = vpop.f32.mrf.mxu0  ;;  %1918 = vmatmul.mubr.msk.f32.gmra.mxu0 %vm1021_vm1, %v1001_v11 }
 0x10b   :  { %v1896_v45 = vpop.f32.mrf.mxu1  ;;  %v1002_v18 = vmax.f32 %v986_v14, 0.0  ;;  %v965_v19 = vadd.f32 %v926_v44, %v723_v16  ;;  %v726_v20 = vadd.f32 %v1864_v17, %v474_v13  ;;  %v989_v22 = vadd.f32 %v2425_v0, %v966_v15 }
 0x10c   :  { %v694_v47 = vpop.f32.mrf.mxu0 }
 0x10d   :  { %v936_v48 = vpop.f32.mrf.mxu1  ;;  %v988_v24 = vadd.f32 %v2425_v0, %v965_v19  ;;  %v968_v25 = vadd.f32 %v1896_v45, %v726_v20  ;;  %v725_v26 = vadd.f32 %v694_v47, %v469_v46  ;;  %1920 = vmatprep.mubr.msk.f32.mxu0 %vm1021_vm1, %v1002_v18  ;;  %v1005_v31 = vmax.f32 %v989_v22, 0.0 }
 0x10e   :  { %v1867_v27 = vpop.f32.mrf.mxu0  ;;  %1921 = vmatmul.mubr.msk.f32.gmra.mxu0 %vm1021_vm1, %v1003_v21 }
 0x10f   :  { %v1899_v49 = vpop.f32.mrf.mxu1  ;;  %v1004_v28 = vmax.f32 %v988_v24, 0.0  ;;  %v967_v29 = vadd.f32 %v936_v48, %v725_v26  ;;  %v728_v30 = vadd.f32 %v1867_v27, %v484_v23  ;;  %v991_v32 = vadd.f32 %v2425_v0, %v968_v25 }
 0x110   :  { %v704_v51 = vpop.f32.mrf.mxu0 }
 0x111   :  { %v990_v52 = vadd.f32 %v2425_v0, %v967_v29  ;;  %v970_v33 = vadd.f32 %v1899_v49, %v728_v30  ;;  %v727_v34 = vadd.f32 %v704_v51, %v479_v50  ;;  %1923 = vmatprep.mubr.msk.f32.mxu0 %vm1021_vm1, %v1004_v28  ;;  %v946_v55 = vpop.f32.mrf.mxu1  ;;  %v1007_v35 = vmax.f32 %v991_v32, 0.0 }
 0x112   :  { %1924 = vmatmul.mubr.msk.f32.gmra.mxu0 %vm1021_vm1, %v1005_v31  ;;  %v1631_v31 = vld [vmem:[%s2514_s9] ss:$0 sm:$0xff] }
 0x113   :  { %v1006_v56 = vmax.f32 %v990_v52, 0.0  ;;  %v969_v57 = vadd.f32 %v946_v55, %v727_v34  ;;  %v993_v53 = vadd.f32 %v2425_v0, %v970_v33 }
 0x115   :  { %v992_v54 = vadd.f32 %v2425_v0, %v969_v57  ;;  %1926 = vmatprep.mubr.msk.f32.mxu0 %vm1021_vm1, %v1006_v56  ;;  %v1009_v58 = vmax.f32 %v993_v53, 0.0  ;;  %v1610_v0 = vld [vmem:[%s2512_s7] ss:$0 sm:$0xff] }
 0x116   :  { %1927 = vmatmul.mubr.msk.f32.gmra.mxu0 %vm1021_vm1, %v1007_v35 }
 0x117   :  { %v1008_v36 = vmax.f32 %v992_v54, 0.0 }
 0x119   :  { %1929 = vmatprep.mubr.msk.f32.mxu0 %vm1021_vm1, %v1008_v36 }
 0x11a   :  { %1930 = vmatmul.mubr.msk.f32.gmra.mxu0 %vm1021_vm1, %v1009_v58 }
 0x1be   :  { %v1910_v60 = vpop.f32.mrf.mxu0 }
 0x1bf   :  { %v1154_v37 = vadd.f32 %v1910_v60, %v1610_v0 }
 0x1c0   :  { %v1148_v38 = vpop.f32.mrf.mxu0 }
 0x1c1   :  { %v1149_v61 = vadd.f32 %v1610_v0, %v1148_v38  ;;  %v1228_v1 = vmax.f32 %v1154_v37, 0.0 }
 0x1c2   :  { %v1913_v62 = vpop.f32.mrf.mxu0 }
 0x1c3   :  { %v1227_v63 = vmax.f32 %v1149_v61, 0.0  ;;  %v1164_v2 = vadd.f32 %v1913_v62, %v1610_v0 }
 0x1c4   :  { %v1158_v39 = vpop.f32.mrf.mxu0 }
 0x1c5   :  { %v1159_v40 = vadd.f32 %v1610_v0, %v1158_v39  ;;  %1940 = vmatprep.mubr.msk.f32.mxu1 %vm1021_vm1, %v1227_v63  ;;  %v1230_v5 = vmax.f32 %v1164_v2, 0.0 }
 0x1c6   :  { %v1916_v3 = vpop.f32.mrf.mxu0  ;;  %1941 = vmatmul.mubr.msk.f32.vlgmr.msra.gmra.mxu1 %vm1021_vm1, %v1228_v1 }
 0x1c7   :  { %v1229_v4 = vmax.f32 %v1159_v40, 0.0  ;;  %v1174_v6 = vadd.f32 %v1916_v3, %v1610_v0 }
 0x1c8   :  { %v1168_v7 = vpop.f32.mrf.mxu0 }
 0x1c9   :  { %v1169_v41 = vadd.f32 %v1610_v0, %v1168_v7  ;;  %1943 = vmatprep.mubr.msk.f32.mxu1 %vm1021_vm1, %v1229_v4  ;;  %v1232_v9 = vmax.f32 %v1174_v6, 0.0 }
 0x1ca   :  { %v1919_v42 = vpop.f32.mrf.mxu0  ;;  %1944 = vmatmul.mubr.msk.f32.gmra.mxu1 %vm1021_vm1, %v1230_v5 }
 0x1cb   :  { %v1231_v8 = vmax.f32 %v1169_v41, 0.0  ;;  %v1184_v10 = vadd.f32 %v1919_v42, %v1610_v0 }
 0x1cc   :  { %v1178_v11 = vpop.f32.mrf.mxu0 }
 0x1cd   :  { %v1179_v12 = vadd.f32 %v1610_v0, %v1178_v11  ;;  %1946 = vmatprep.mubr.msk.f32.mxu1 %vm1021_vm1, %v1231_v8  ;;  %v1234_v13 = vmax.f32 %v1184_v10, 0.0 }
 0x1ce   :  { %v1922_v43 = vpop.f32.mrf.mxu0  ;;  %1947 = vmatmul.mubr.msk.f32.gmra.mxu1 %vm1021_vm1, %v1232_v9 }
 0x1cf   :  { %v1233_v44 = vmax.f32 %v1179_v12, 0.0  ;;  %v1194_v14 = vadd.f32 %v1922_v43, %v1610_v0 }
 0x1d0   :  { %v1188_v15 = vpop.f32.mrf.mxu0 }
 0x1d1   :  { %v1189_v16 = vadd.f32 %v1610_v0, %v1188_v15  ;;  %1949 = vmatprep.mubr.msk.f32.mxu1 %vm1021_vm1, %v1233_v44  ;;  %v1236_v46 = vmax.f32 %v1194_v14, 0.0 }
 0x1d2   :  { %v1925_v17 = vpop.f32.mrf.mxu0  ;;  %1950 = vmatmul.mubr.msk.f32.gmra.mxu1 %vm1021_vm1, %v1234_v13 }
 0x1d3   :  { %v1235_v45 = vmax.f32 %v1189_v16, 0.0  ;;  %v1204_v18 = vadd.f32 %v1925_v17, %v1610_v0 }
 0x1d4   :  { %v1198_v19 = vpop.f32.mrf.mxu0 }
 0x1d5   :  { %v1199_v20 = vadd.f32 %v1610_v0, %v1198_v19  ;;  %1952 = vmatprep.mubr.msk.f32.mxu1 %vm1021_vm1, %v1235_v45  ;;  %v1238_v47 = vmax.f32 %v1204_v18, 0.0 }
 0x1d6   :  { %v1928_v21 = vpop.f32.mrf.mxu0  ;;  %1953 = vmatmul.mubr.msk.f32.gmra.mxu1 %vm1021_vm1, %v1236_v46 }
 0x1d7   :  { %v1237_v22 = vmax.f32 %v1199_v20, 0.0  ;;  %v1214_v48 = vadd.f32 %v1928_v21, %v1610_v0 }
 0x1d8   :  { %v1208_v23 = vpop.f32.mrf.mxu0 }
 0x1d9   :  { %v1209_v24 = vadd.f32 %v1610_v0, %v1208_v23  ;;  %1955 = vmatprep.mubr.msk.f32.mxu1 %vm1021_vm1, %v1237_v22  ;;  %v1240_v27 = vmax.f32 %v1214_v48, 0.0 }
 0x1da   :  { %v1931_v25 = vpop.f32.mrf.mxu0  ;;  %1956 = vmatmul.mubr.msk.f32.gmra.mxu1 %vm1021_vm1, %v1238_v47 }
 0x1db   :  { %v1239_v26 = vmax.f32 %v1209_v24, 0.0  ;;  %v1224_v49 = vadd.f32 %v1931_v25, %v1610_v0 }
 0x1dc   :  { %v1218_v50 = vpop.f32.mrf.mxu0 }
 0x1dd   :  { %v1219_v28 = vadd.f32 %v1610_v0, %v1218_v50  ;;  %1958 = vmatprep.mubr.msk.f32.mxu1 %vm1021_vm1, %v1239_v26  ;;  %v1242_v30 = vmax.f32 %v1224_v49, 0.0 }
 0x1de   :  { %1959 = vmatmul.mubr.msk.f32.gmra.mxu1 %vm1021_vm1, %v1240_v27 }
 0x1df   :  { %v1241_v29 = vmax.f32 %v1219_v28, 0.0 }
 0x1e1   :  { %1961 = vmatprep.mubr.msk.f32.mxu1 %vm1021_vm1, %v1241_v29 }
 0x1e2   :  { %1962 = vmatmul.mubr.msk.f32.gmra.mxu1 %vm1021_vm1, %v1242_v30 }
 0x286   :  { %v1942_v32 = vpop.f32.mrf.mxu1 }
 0x288   :  { %v1380_v51 = vpop.f32.mrf.mxu1 }
 0x289   :  { %v1381_v52 = vadd.f32 %v1631_v31, %v1380_v51 }
 0x28a   :  { %v1945_v33 = vpop.f32.mrf.mxu1 }
 0x28b   :  { %1460 = vst.msk [vmem:[#allocation2] sm:$0xff] %vm1459_vm2, %v1381_v52 }
 0x28c   :  { %v1390_v34 = vpop.f32.mrf.mxu1 }
 0x28e   :  { %v1948_v55 = vpop.f32.mrf.mxu1 }
 0x290   :  { %v1400_v56 = vpop.f32.mrf.mxu1 }
 0x292   :  { %v1506_v57 = vld [vmem:[#allocation2] sm:$0xff]  ;;  %v1951_v35 = vpop.f32.mrf.mxu1 }
 0x293   :  { %1507 = vst [vmem:[%s2515_s10] sm:$0xff] %v1506_v57 }
 0x294   :  { %v1410_v53 = vpop.f32.mrf.mxu1 }
 0x296   :  { %v1954_v54 = vpop.f32.mrf.mxu1 }
 0x298   :  { %v1420_v36 = vpop.f32.mrf.mxu1 }
 0x29a   :  { %v1957_v58 = vpop.f32.mrf.mxu1 }
 0x29c   :  { %v1430_v59 = vpop.f32.mrf.mxu1 }
 0x29e   :  { %v1960_v0 = vpop.f32.mrf.mxu1 }
 0x2a0   :  { %v1440_v60 = vpop.f32.mrf.mxu1 }
 0x2a2   :  { %v1963_v37 = vpop.f32.mrf.mxu1 }
 0x2a4   :  { %v1450_v38 = vpop.f32.mrf.mxu1 }

</bundles_post_ra>
